<compile_context>
chip_gen: v5e
topology: v5e:2x2
jax: 0.10.0
libtpu: 0.0.40
codegen_flags: <defaults>
</compile_context>

<pallas_src>
import functools

import jax
import jax.numpy as jnp
from jax.experimental import pallas as pl
from jax.experimental.pallas import tpu as pltpu


def _round_up(x: int, m: int) -> int:
    return (x + m - 1) // m * m


def _cdiv(a: int, b: int) -> int:
    return (a + b - 1) // b


def _gelu_tanh(x):
    # tanh-approximate GELU: the transcendental goes to the EUP slot.
    c = 0.7978845608028654  # sqrt(2/pi)
    return 0.5 * x * (1.0 + jnp.tanh(c * (x + 0.044715 * x * x * x)))


def _mlp_kernel(x_ref, w1_ref, b1_ref, w2_ref, b2_ref, o_ref):
    # One row tile does the whole MLP; weights/biases are VMEM-resident
    # (constant block index -> fetched once, reused across the grid).
    x = x_ref[...].astype(jnp.bfloat16)  # in-kernel cast, no wrapper HBM pass

    # fc1: (tm, D_in) bf16 @ (D_in, H) bf16 -> f32 on MXU; bias in f32.
    h = jnp.dot(x, w1_ref[...], preferred_element_type=jnp.float32)
    h = h + b1_ref[...]
    # GELU in bf16 (h is truncated to bf16 for the fc2 matmul anyway).
    h = _gelu_tanh(h.astype(jnp.bfloat16))

    # TODO(synk): nn.Dropout implemented as eval-mode identity (no RNG masking).

    # fc2: (tm, H) bf16 @ (H, D_out) bf16 -> f32 on MXU; bias + GELU in f32.
    y = jnp.dot(h, w2_ref[...], preferred_element_type=jnp.float32)
    y = _gelu_tanh(y + b2_ref[...])
    o_ref[...] = y.astype(o_ref.dtype)


@functools.partial(jax.jit, static_argnames=("tm",))
def mlp_pallas(x, w1, b1, w2, b2, *, tm=256):
    """x: (B, N, D_in) -> (B, N, D_out).  w1: (D_in, H), w2: (H, D_out)."""
    B, N, D_in = x.shape
    H = w1.shape[1]
    D_out = w2.shape[1]
    M = B * N

    # Row tile: multiple of 8 sublanes, capped at the (rounded) row count;
    # ensure >=2 row tiles when possible so both v7x TensorCores get work.
    tm = max(8, min(_round_up(tm, 8), _round_up(M, 8)))
    if M > 8 and _cdiv(M, tm) < 2:
        tm = max(8, _round_up(_cdiv(M, 2), 8))
    grid_m = _cdiv(M, tm)  # ragged last tile handled by Pallas

    x2d = x.reshape(M, D_in)                # view only, no data movement
    w1c = w1.astype(jnp.bfloat16)           # no-op if caller pre-casts to bf16
    w2c = w2.astype(jnp.bfloat16)
    b1r = b1.astype(jnp.float32).reshape(1, H)
    b2r = b2.astype(jnp.float32).reshape(1, D_out)

    out_dtype = x.dtype

    # Right-sized VMEM budget: resident weights (worst case: 2 pipeline bufs)
    # + double-buffered x/out tiles + in-kernel intermediates + headroom.
    weight_bytes = 2 * ((D_in * H + H * D_out) * 2 + (H + D_out) * 4)
    tile_bytes = 2 * tm * D_in * jnp.dtype(x.dtype).itemsize \
               + 2 * tm * D_out * jnp.dtype(out_dtype).itemsize
    interm_bytes = tm * H * (4 + 2) + tm * D_in * 2 + tm * D_out * 4
    vmem_limit = int(min(max(weight_bytes + tile_bytes + interm_bytes + (8 << 20),
                             16 << 20),
                         96 << 20))

    out2d = pl.pallas_call(
        _mlp_kernel,
        out_shape=jax.ShapeDtypeStruct((M, D_out), out_dtype),
        grid_spec=pltpu.PrefetchScalarGridSpec(
            num_scalar_prefetch=0,
            grid=(grid_m,),
            in_specs=[
                pl.BlockSpec((tm, D_in), lambda i: (i, 0)),   # x row tile (streamed)
                pl.BlockSpec((D_in, H), lambda i: (0, 0)),    # W1 resident
                pl.BlockSpec((1, H), lambda i: (0, 0)),       # b1 resident
                pl.BlockSpec((H, D_out), lambda i: (0, 0)),   # W2 resident
                pl.BlockSpec((1, D_out), lambda i: (0, 0)),   # b2 resident
            ],
            out_specs=pl.BlockSpec((tm, D_out), lambda i: (i, 0)),
        ),
        compiler_params=pltpu.CompilerParams(
            dimension_semantics=("parallel",),
            vmem_limit_bytes=vmem_limit,
        ),
    )(x2d, w1c, b1r, w2c, b2r)

    return out2d.reshape(B, N, D_out)


def reference_mlp(x, w1, b1, w2, b2):
    """Pure-JAX reference mirroring the kernel's compute path (bf16 MXU ops,
    f32 accumulation, bf16 first GELU, f32 second GELU, eval-mode dropout)."""
    B, N, D_in = x.shape
    D_out = w2.shape[1]
    x2d = x.reshape(B * N, D_in).astype(jnp.bfloat16)
    h = jnp.dot(x2d, w1.astype(jnp.bfloat16), preferred_element_type=jnp.float32)
    h = _gelu_tanh((h + b1.astype(jnp.float32)).astype(jnp.bfloat16))
    y = jnp.dot(h, w2.astype(jnp.bfloat16), preferred_element_type=jnp.float32)
    y = _gelu_tanh(y + b2.astype(jnp.float32))
    return y.reshape(B, N, D_out).astype(x.dtype)


if __name__ == "__main__":
    # Small ViT-ish shapes: batch=2, tokens=8, in=32, hidden=64, out=32
    B, N, D_in, H, D_out = 2, 8, 32, 64, 32

    key = jax.random.PRNGKey(0)
    kx, kw1, kb1, kw2, kb2 = jax.random.split(key, 5)

    x = jax.random.normal(kx, (B, N, D_in), dtype=jnp.float32)
    # Deterministic parameter init (uniform, ~nn.Linear scale).  In production,
    # pre-cast w1/w2 to bf16 once outside the jit to avoid per-call casts.
    w1 = jax.random.uniform(kw1, (D_in, H), jnp.float32, -1.0, 1.0) / jnp.sqrt(D_in)
    b1 = jax.random.uniform(kb1, (H,), jnp.float32, -1.0, 1.0) / jnp.sqrt(D_in)
    w2 = jax.random.uniform(kw2, (H, D_out), jnp.float32, -1.0, 1.0) / jnp.sqrt(H)
    b2 = jax.random.uniform(kb2, (D_out,), jnp.float32, -1.0, 1.0) / jnp.sqrt(H)

    out = mlp_pallas(x, w1, b1, w2, b2)
    jax.block_until_ready(out)

    ref = reference_mlp(x, w1, b1, w2, b2)
    assert out.shape == (B, N, D_out)
    assert jnp.allclose(out, ref, atol=1e-2, rtol=1e-2), "mismatch vs reference"

    print("KERNEL_OK")
</pallas_src>

<mosaic_0001>
module attributes {stable_mosaic.version = 11 : i64} {
  func.func @_mlp_kernel(%arg0: i32, %arg1: memref<8x32xf32, #tpu.memory_space<vmem>>, %arg2: memref<32x64xbf16, #tpu.memory_space<vmem>>, %arg3: memref<1x64xf32, #tpu.memory_space<vmem>>, %arg4: memref<64x32xbf16, #tpu.memory_space<vmem>>, %arg5: memref<1x32xf32, #tpu.memory_space<vmem>>, %arg6: memref<8x32xf32, #tpu.memory_space<vmem>>) attributes {dimension_semantics = [#tpu.dimension_semantics<parallel>], iteration_bounds = array<i64: 2>, scalar_prefetch = 0 : i64, scratch_operands = 0 : i64, tpu.core_type = #tpu.core_type<tc>, window_params = [{transform_indices = @transform_0, window_bounds = array<i64: 8, 32>}, {pipeline_mode = #tpu.pipeline_mode<synchronous>, transform_indices = @transform_1, window_bounds = array<i64: 32, 64>}, {pipeline_mode = #tpu.pipeline_mode<synchronous>, transform_indices = @transform_2, window_bounds = array<i64: 1, 64>}, {pipeline_mode = #tpu.pipeline_mode<synchronous>, transform_indices = @transform_3, window_bounds = array<i64: 64, 32>}, {pipeline_mode = #tpu.pipeline_mode<synchronous>, transform_indices = @transform_4, window_bounds = array<i64: 1, 32>}, {transform_indices = @transform_5, window_bounds = array<i64: 8, 32>}]} {
    %c0 = arith.constant 0 : index
    %c0_0 = arith.constant 0 : index
    %0 = vector.load %arg1[%c0, %c0_0] : memref<8x32xf32, #tpu.memory_space<vmem>>, vector<8x32xf32>
    %1 = arith.truncf %0 : vector<8x32xf32> to vector<8x32xbf16>
    %c0_1 = arith.constant 0 : index
    %c0_2 = arith.constant 0 : index
    %2 = vector.load %arg2[%c0_1, %c0_2] : memref<32x64xbf16, #tpu.memory_space<vmem>>, vector<32x64xbf16>
    %cst = arith.constant dense<0.000000e+00> : vector<8x64xf32>
    %3 = tpu.matmul %1, %2, %cst {dimension_numbers = #tpu.dot_dimension_numbers<[1], [0], [0], [1], [0, 0, 1, 1], [], []>} : vector<8x32xbf16>, vector<32x64xbf16>, vector<8x64xf32> -> vector<8x64xf32>
    %c0_3 = arith.constant 0 : index
    %c0_4 = arith.constant 0 : index
    %4 = vector.load %arg3[%c0_3, %c0_4] : memref<1x64xf32, #tpu.memory_space<vmem>>, vector<1x64xf32>
    %5 = vector.broadcast %4 : vector<1x64xf32> to vector<8x64xf32>
    %6 = arith.addf %3, %5 : vector<8x64xf32>
    %7 = arith.truncf %6 : vector<8x64xf32> to vector<8x64xbf16>
    %cst_5 = arith.constant 5.000000e-01 : bf16
    %8 = vector.broadcast %cst_5 : bf16 to vector<8x64xbf16>
    %9 = arith.mulf %8, %7 : vector<8x64xbf16>
    %cst_6 = arith.constant 4.467770e-02 : bf16
    %10 = vector.broadcast %cst_6 : bf16 to vector<8x64xbf16>
    %11 = arith.mulf %10, %7 : vector<8x64xbf16>
    %12 = arith.mulf %11, %7 : vector<8x64xbf16>
    %13 = arith.mulf %12, %7 : vector<8x64xbf16>
    %14 = arith.addf %7, %13 : vector<8x64xbf16>
    %cst_7 = arith.constant 7.968750e-01 : bf16
    %15 = vector.broadcast %cst_7 : bf16 to vector<8x64xbf16>
    %16 = arith.mulf %15, %14 : vector<8x64xbf16>
    %17 = math.tanh %16 : vector<8x64xbf16>
    %cst_8 = arith.constant 1.000000e+00 : bf16
    %18 = vector.broadcast %cst_8 : bf16 to vector<8x64xbf16>
    %19 = arith.addf %18, %17 : vector<8x64xbf16>
    %20 = arith.mulf %9, %19 : vector<8x64xbf16>
    %c0_9 = arith.constant 0 : index
    %c0_10 = arith.constant 0 : index
    %21 = vector.load %arg4[%c0_9, %c0_10] : memref<64x32xbf16, #tpu.memory_space<vmem>>, vector<64x32xbf16>
    %cst_11 = arith.constant dense<0.000000e+00> : vector<8x32xf32>
    %22 = tpu.matmul %20, %21, %cst_11 {dimension_numbers = #tpu.dot_dimension_numbers<[1], [0], [0], [1], [0, 0, 1, 1], [], []>} : vector<8x64xbf16>, vector<64x32xbf16>, vector<8x32xf32> -> vector<8x32xf32>
    %c0_12 = arith.constant 0 : index
    %c0_13 = arith.constant 0 : index
    %23 = vector.load %arg5[%c0_12, %c0_13] : memref<1x32xf32, #tpu.memory_space<vmem>>, vector<1x32xf32>
    %24 = vector.broadcast %23 : vector<1x32xf32> to vector<8x32xf32>
    %25 = arith.addf %22, %24 : vector<8x32xf32>
    %cst_14 = arith.constant 5.000000e-01 : f32
    %26 = vector.broadcast %cst_14 : f32 to vector<8x32xf32>
    %27 = arith.mulf %26, %25 : vector<8x32xf32>
    %cst_15 = arith.constant 4.471500e-02 : f32
    %28 = vector.broadcast %cst_15 : f32 to vector<8x32xf32>
    %29 = arith.mulf %28, %25 : vector<8x32xf32>
    %30 = arith.mulf %29, %25 : vector<8x32xf32>
    %31 = arith.mulf %30, %25 : vector<8x32xf32>
    %32 = arith.addf %25, %31 : vector<8x32xf32>
    %cst_16 = arith.constant 0.797884583 : f32
    %33 = vector.broadcast %cst_16 : f32 to vector<8x32xf32>
    %34 = arith.mulf %33, %32 : vector<8x32xf32>
    %35 = math.tanh %34 : vector<8x32xf32>
    %cst_17 = arith.constant 1.000000e+00 : f32
    %36 = vector.broadcast %cst_17 : f32 to vector<8x32xf32>
    %37 = arith.addf %36, %35 : vector<8x32xf32>
    %38 = arith.mulf %27, %37 : vector<8x32xf32>
    %c0_18 = arith.constant 0 : index
    %c0_19 = arith.constant 0 : index
    %39 = vector.load %arg6[%c0_18, %c0_19] : memref<8x32xf32, #tpu.memory_space<vmem>>, vector<8x32xf32>
    tpu.vector_store %arg6[%c0_18, %c0_19], %38 {strides = array<i32>} : memref<8x32xf32, #tpu.memory_space<vmem>>, vector<8x32xf32>,
    return
  }
  func.func @transform_0(%arg0: i32) -> (i32, i32) {
    %c0_i32 = arith.constant 0 : i32
    %c0_i32_0 = arith.constant 0 : i32
    return %arg0, %c0_i32 : i32, i32
  }
  func.func @transform_1(%arg0: i32) -> (i32, i32) {
    %c0_i32 = arith.constant 0 : i32
    %c0_i32_0 = arith.constant 0 : i32
    %c0_i32_1 = arith.constant 0 : i32
    return %c0_i32, %c0_i32_0 : i32, i32
  }
  func.func @transform_2(%arg0: i32) -> (i32, i32) {
    %c0_i32 = arith.constant 0 : i32
    %c0_i32_0 = arith.constant 0 : i32
    %c0_i32_1 = arith.constant 0 : i32
    return %c0_i32, %c0_i32_0 : i32, i32
  }
  func.func @transform_3(%arg0: i32) -> (i32, i32) {
    %c0_i32 = arith.constant 0 : i32
    %c0_i32_0 = arith.constant 0 : i32
    %c0_i32_1 = arith.constant 0 : i32
    return %c0_i32, %c0_i32_0 : i32, i32
  }
  func.func @transform_4(%arg0: i32) -> (i32, i32) {
    %c0_i32 = arith.constant 0 : i32
    %c0_i32_0 = arith.constant 0 : i32
    %c0_i32_1 = arith.constant 0 : i32
    return %c0_i32, %c0_i32_0 : i32, i32
  }
  func.func @transform_5(%arg0: i32) -> (i32, i32) {
    %c0_i32 = arith.constant 0 : i32
    %c0_i32_0 = arith.constant 0 : i32
    return %arg0, %c0_i32 : i32, i32
  }
}

</mosaic_0001>

<bundles_post_ra>
// kernel: mlp_pallas.1
= control target key start
LH: loop header
LB: loop body
LE: loop exit
PB: predicated region body
PF: predicated region fallthrough
CT: control target
= control target key end

     0   :  { %10 = vsyncpa [#allocation3], 0  ;;  %s718_s0 = inlined_call_operand.vmem [shape: f32[16,32], index: 0, kind: input, shape index: {}]   ;;  %s719_s1 = inlined_call_operand.vmem [shape: bf16[32,64], index: 1, kind: input, shape index: {}]   ;;  %s720_s2 = inlined_call_operand.vmem [shape: f32[1,64], index: 2, kind: input, shape index: {}]   ;;  %s721_s3 = inlined_call_operand.vmem [shape: bf16[64,32], index: 3, kind: input, shape index: {}]   ;;  %s722_s4 = inlined_call_operand.vmem [shape: f32[1,32], index: 4, kind: input, shape index: {}]   ;;  %s723_s5 = inlined_call_operand.hbm [shape: f32[16,32], index: 5, kind: output, shape index: {}]  }
   0x1   :  { %12 = vsyncpa [#allocation3 + $0x1], 0  ;;  %s607_s18 = smov 0   ;;  %s609_s19 = smov 0  }
   0x2   :  { %s611_s20 = smov 0   ;;  %s613_s21 = smov 0  }
   0x3 LB: > { %s628_s22 = sadd.s32 4294967295, %s575_s21   ;;  %s426_s23 = sadd.s32 4294967294, %s575_s21   ;;  %s575_s21 = sphi %s613_s21, %s729_s21   ;;  %s571_s20 = sphi %s611_s20, %s728_s20   ;;  %s567_s19 = sphi %s609_s19, %s727_s19   ;;  %s563_s18 = sphi %s607_s18, %s726_s18  }
   0x4   : > { %s632_s24 = sadd.s32 1, %s575_s21   ;;  %s135_s25 = sadd.s32 1, %s571_s20 }
   0x5   : > { %s132_s26 = ssub.s32 %s575_s21, %s632_s24  ;;  %p145_p0 = scmp.ne.s32.totalorder %s571_s20, %s567_s19 }
   0x6   : > { %p133_p1 = scmp.eq.s32.totalorder %s132_s26, 0  ;;  %p146_p2 = scmp.eq.s32.totalorder %s628_s22, 1 }
   0x7   : > { %p151_p3 = scmp.ne.s32.totalorder %s567_s19, %s563_s18  ;;  %p152_p4 = scmp.eq.s32.totalorder %s426_s23, 1 }
   0x8   : > { %s643_s27 = scalar_select %p133_p1, %s571_s20, %s135_s25  }
   0x9   : > { %p645_p5 = por %p146_p2, %p145_p0  ;;  %p649_p6 = por %p152_p4, %p151_p3 }
   0xa   : > { %p429_p7 = scmp.ge.s32.totalorder %s575_s21, 1  ;;  %p189_p8 = scmp.lt.s32.totalorder %s575_s21, 3 }
   0xc   : > { %p190_p9 = pnand %p429_p7, %p189_p8 }
   0xd   : > { %p216_p10 = scmp.lt.s32.totalorder (!%p190_p9), %s628_s22, 1  ;;  %s459_s12 = sshll.u32 (!%p190_p9), %s628_s22, 3 }
   0xe   : > { %193 = sbr.rel (%p190_p9) target bundleno = 362 (0x16a), region = 40  ;;  %s362_s15 = scalar_lea.hbm (!%p190_p9), %s723_s5, %s459_s12 }
   0xf   : > { %s366_s23 = sshll.u32 (!%p190_p9), %s362_s15, 4  ;;  %s533_s7 = scalar_lea.hbm (!%p190_p9), %s723_s5, 16  ;;  %s367_s23 = int_to_ptr.hbm [resolvable:$true] %s366_s23 }
  0x10   : > { %s527_s26 = sshra.s32 (!%p190_p9), %s367_s23, 4  ;;  %s528_s26 = int_to_ptr.hbm [resolvable:$true] %s527_s26 }
  0x11   : > { %p534_p0 = scmp.lt.s32.totalorder (!%p190_p9), %s528_s26, %s723_s5 }
  0x13   : > { %v463_v0 = vld [vmem:[%s719_s1 + $0x8] sm:$0xff]  ;;  %v462_v1 = vld [vmem:[%s719_s1] sm:$0xff]  ;;  %s217_s9 = scalar_select %p216_p10, %s628_s22, 1  ;;  %vm243_vm0 = vcmask 261120   ;;  %v467_v4 = vld [vmem:[%s721_s3 + $0x18] sm:$0xff]  ;;  %vm324_vm1 = vcmask 523264  }
  0x14   : > { %253 = vmatpush.bf16.msra.mxu0 %v463_v0  ;;  %332 = vmatpush.bf16.msra.mxu1 %v467_v4  ;;  %v466_v5 = vld [vmem:[%s721_s3 + $0x10] sm:$0xff]  ;;  %v507_v6 = vld [vmem:[%s720_s2] ss:$0 sm:$0xff]  ;;  %v465_v7 = vld [vmem:[%s721_s3 + $0x8] sm:$0xff]  ;;  %s529_s22 = scalar_lea.hbm %s528_s26, 8 }
  0x15   : > { %s431_s10 = sshll.u32 %s217_s9, 3  ;;  %v464_v10 = vld [vmem:[%s721_s3] sm:$0xff]  ;;  %p530_p11 = scmp.ne.s32.totalorder %s528_s26, %s529_s22 }
  0x16   : > { %s219_s13 = scalar_lea.vmem %s718_s0, %s431_s10  ;;  %v508_v40 = vld [vmem:[%s722_s4] ss:$0 sm:$0xff]  ;;  %s213_s10 = sand.u32 1, %s567_s19  }
  0x17   : > { %v221_v2 = vld [vmem:[%s219_s13] sm:$0xff]  ;;  %s430_s11 = sshll.u32 %s213_s10, 3  ;;  %s352_s25 = scalar_lea.sflag [#allocation3], %s213_s10 }
  0x18   : > { %254 = vmatpush.bf16.msra.mxu0 %v462_v1  ;;  %v222_v3 = vpack.c.bf16 %v221_v2, %v221_v2  ;;  %333 = vmatpush.bf16.msra.mxu1 %v466_v5  ;;  %s215_s16 = scalar_lea.vmem [#allocation2], %s430_s11  ;;  %p531_p12 = pnand %p530_p11, %p645_p5 }
  0x19   : > { %s364_s17 = sshll.u32 %s215_s16, 4  ;;  %p535_p1 = scmp.lt.s32.totalorder %s533_s7, %s529_s22  ;;  %s365_s17 = int_to_ptr.vmem [resolvable:$true] %s364_s17 }
  0x1a   : > { %p532_p13 = pneg %p531_p12 }
  0x1b   : > { %440 = vmatmul.msk.bf16.vlgmr.msra.gmra.mxu0 %vm243_vm0, %v222_v3  ;;  %p536_p2 = por %p535_p1, %p534_p0 }
  0x1c   : > { %334 = vmatpush.bf16.msra.mxu1 %v465_v7 }
  0x1d   : > { %p537_p3 = pnand %p536_p2, %p532_p13 }
  0x20   : > { %335 = vmatpush.bf16.msra.mxu1 %v464_v10 }
  0x98   : > { %v256_v8 = vpop.f32.mrf.mxu0 }
  0x99   : > { %v257_v9 = vadd.f32 %v507_v6, %v256_v8 }
  0x9b   : > { %v260_v11 = vpack.c.bf16 %v257_v9, %v257_v9 }
  0x9d   : > { %v261_v12 = vunpack.c.l.bf16 %v260_v11 }
  0x9f   : > { %v264_v13 = vmul.f32 0.044677734, %v261_v12  ;;  %v262_v30 = vmul.f32 0.5, %v261_v12 }
  0xa0   : > { %v258_v14 = vpop.f32.mrf.mxu0 }
  0xa1   : > { %v265_v15 = vpack.c.bf16 %v264_v13, %v264_v13  ;;  %v263_v33 = vpack.c.bf16 %v262_v30, %v262_v30 }
  0xa3   : > { %v266_v16 = vunpack.c.l.bf16 %v265_v15  ;;  %v284_v36 = vunpack.c.l.bf16 %v263_v33 }
  0xa5   : > { %v267_v17 = vmul.f32 %v266_v16, %v261_v12 }
  0xa7   : > { %v268_v18 = vpack.c.bf16 %v267_v17, %v267_v17 }
  0xa9   : > { %v269_v19 = vunpack.c.l.bf16 %v268_v18 }
  0xab   : > { %v270_v20 = vmul.f32 %v269_v19, %v261_v12 }
  0xad   : > { %v271_v21 = vpack.c.bf16 %v270_v20, %v270_v20 }
  0xaf   : > { %v272_v22 = vunpack.c.l.bf16 %v271_v21 }
  0xb1   : > { %v273_v23 = vadd.f32 %v272_v22, %v261_v12 }
  0xb3   : > { %v274_v24 = vpack.c.bf16 %v273_v23, %v273_v23 }
  0xb5   : > { %v275_v25 = vunpack.c.l.bf16 %v274_v24 }
  0xb7   : > { %v276_v26 = vmul.f32 0.796875, %v275_v25 }
  0xb9   : > { %v277_v27 = vpack.c.bf16 %v276_v26, %v276_v26 }
  0xbb   : > { %v278_v28 = vunpack.c.l.bf16 %v277_v27 }
  0xbd   : > { %509 = vtanh.f32 %v278_v28 }
  0xc3   : > { %v510_v29 = vpop.eup %509 }
  0xc4   : > { %v280_v31 = vpack.c.bf16 %v510_v29, %v510_v29 }
  0xc6   : > { %v281_v32 = vunpack.c.l.bf16 %v280_v31 }
  0xc8   : > { %v282_v34 = vadd.f32 1.0, %v281_v32 }
  0xca   : > { %v283_v35 = vpack.c.bf16 %v282_v34, %v282_v34 }
  0xcc   : > { %v285_v37 = vunpack.c.l.bf16 %v283_v35 }
  0xce   : > { %v286_v38 = vmul.f32 %v285_v37, %v284_v36 }
  0xd0   : > { %v287_v39 = vpack.c.bf16 %v286_v38, %v286_v38 }
  0xd2   : > { %457 = vmatmul.msk.bf16.vlgmr.msra.gmra.mxu1 %vm324_vm1, %v287_v39 }
 0x14f   : > { %v337_v41 = vpop.f32.mrf.mxu1 }
 0x150   : > { %v338_v42 = vadd.f32 %v508_v40, %v337_v41 }
 0x152   : > { %v342_v43 = vmul.f32 0.044715, %v338_v42  ;;  %v341_v50 = vmul.f32 0.5, %v338_v42 }
 0x154   : > { %v343_v44 = vmul.f32 %v342_v43, %v338_v42 }
 0x156   : > { %v344_v45 = vmul.f32 %v343_v44, %v338_v42 }
 0x157   : > { %v339_v46 = vpop.f32.mrf.mxu1 }
 0x158   : > { %v345_v47 = vadd.f32 %v344_v45, %v338_v42 }
 0x15a   : > { %v346_v48 = vmul.f32 0.7978846, %v345_v47 }
 0x15c   : > { %511 = vtanh.f32 %v346_v48 }
 0x162   : > { %v512_v49 = vpop.eup %511 }
 0x163   : > { %v348_v51 = vadd.f32 1.0, %v512_v49 }
 0x165   : > { %v349_v52 = vmul.f32 %v348_v51, %v341_v50 }
 0x167   : > { %350 = vst.msk [vmem:[%s215_s16] sm:$0xff] %vm243_vm0, %v349_v52 }
 0x168   : > { %540 = shalt.err (!%p537_p3)
}
 0x169   : > { %468 = dma.vmem_to_hbm [thread:$0]  (%p645_p5), %s365_s17, 128, %s367_s23, %s352_s25  }
 0x16a PF: > { %p474_p4 = scmp.ge.s32.totalorder %s575_s21, 2  ;;  %s378_s10 = sand.u32 1, %s563_s18  }
 0x16b   : > { %s379_s11 = scalar_lea.sflag [#allocation3], %s378_s10 }
 0x16c   : > { %p471_p7 = pnand %p474_p4, %p649_p6 }
 0x16e   : > { %p472_p8 = pneg %p471_p7 }
 0x170   : > { %558 = dma.done.wait (%p472_p8), %s379_s11, 128  }
 0x171   : > { %560 = vsyncadd (%p472_p8), %s379_s11, 4294967168  ;;  %p15_p9 = scmp.ge.s32.totalorder %s632_s24, 4   ;;  %s726_s18 = smov %s567_s19 }
 0x172   : > { %s727_s19 = smov %s571_s20  ;;  %s728_s20 = smov %s643_s27 }
 0x173   : > { %s729_s21 = smov %s632_s24  ;;  %17 = sbr.rel (!%p15_p9) target bundleno = 3 (0x3), region = 75 }
 0x178   :  { %385 = vsyncpa [#allocation3], 1 }
 0x179   :  { %387 = vsyncpa [#allocation3 + $0x1], 1 }

</bundles_post_ra>
